<compile_context>
chip_gen: v5e
topology: v5e:2x2
jax: 0.10.0
libtpu: 0.0.40
codegen_flags: <defaults>
</compile_context>

<pallas_src>
import functools
import math

import jax
import jax.numpy as jnp
from jax.experimental import pallas as pl
from jax.experimental.pallas import tpu as pltpu

_COMPUTE_DTYPE = jnp.bfloat16  # adj/x/W streamed in bf16, accumulation in f32


def _round_up(x, m):
    return (x + m - 1) // m * m


def _fused_gcn_kernel(adj_ref, x_ref, w1_ref, b1_ref, w2_ref, b2_ref,
                      y_ref, support_ref, h_ref, acc_ref, *, tm, tk):
    """Grid = (layer, adj row tile, adj column tile (reduction))."""
    layer = pl.program_id(0)   # 0: gc1 (+relu), 1: gc2
    i = pl.program_id(1)       # adj row tile
    k = pl.program_id(2)       # adj column tile (reduction axis, last by convention)
    nk = pl.num_programs(2)

    # Hoisted support = x @ W1 (layer 0) or h @ W2 (layer 1): computed once per
    # layer on its first grid step, kept resident in VMEM for all row tiles.
    @pl.when(jnp.logical_and(i == 0, k == 0))
    def _compute_support():
        @pl.when(layer == 0)
        def _():
            s = jnp.dot(x_ref[...], w1_ref[...],
                        preferred_element_type=jnp.float32)
            support_ref[...] = s.astype(support_ref.dtype)

        @pl.when(layer == 1)
        def _():
            s = jnp.dot(h_ref[...], w2_ref[...],
                        preferred_element_type=jnp.float32)
            support_ref[...] = s.astype(support_ref.dtype)

    @pl.when(k == 0)
    def _init_acc():
        acc_ref[...] = jnp.zeros_like(acc_ref)

    # Stream adj: (tm, tk) tile times the matching support rows, f32 accumulate.
    k_start = pl.multiple_of(k * tk, tk)
    acc_ref[...] += jnp.dot(adj_ref[...],
                            support_ref[pl.ds(k_start, tk), :],
                            preferred_element_type=jnp.float32)

    @pl.when(k == nk - 1)
    def _finalize():
        @pl.when(layer == 0)
        def _():
            h_tile = jnp.maximum(acc_ref[...] + b1_ref[...], 0.0)
            # TODO(synk): F.dropout in training mode (random masking) not
            # implemented; eval-mode dropout is the identity.
            row_start = pl.multiple_of(i * tm, tm)
            h_ref[pl.ds(row_start, tm), :] = h_tile.astype(h_ref.dtype)

        @pl.when(layer == 1)
        def _():
            y_ref[...] = (acc_ref[...] + b2_ref[...]).astype(y_ref.dtype)


def _gcn_forward_impl(x, adj, w1, b1, w2, b2):
    n = adj.shape[0]
    nfeat = x.shape[1]
    nhid = w1.shape[1]
    nclass = w2.shape[1]

    # ---- tile plan --------------------------------------------------------
    if n <= 1024:
        n_pad = _round_up(n, 128)
        tm = tk = n_pad                      # single lane-dense tile
    else:
        tm, tk = 512, 1024                   # fits 32 MiB scoped VMEM budget
        n_pad = _round_up(n, 1024)           # lcm(tm, tk)

    f_pad = _round_up(nfeat, 128)
    d_pad = max(_round_up(nhid, 128), _round_up(nclass, 128))
    # TODO(synk): very large nfeat (e.g. identity features, nfeat == N >> VMEM)
    # would need a tiled support stage instead of a resident x block.

    # ---- zero-pad to lane-dense shapes, cast streaming operands to bf16 ----
    cd = _COMPUTE_DTYPE
    adj_p = jnp.zeros((n_pad, n_pad), cd).at[:n, :n].set(adj.astype(cd))
    x_p = jnp.zeros((n_pad, f_pad), cd).at[:n, :nfeat].set(x.astype(cd))
    w1_p = jnp.zeros((f_pad, d_pad), cd).at[:nfeat, :nhid].set(w1.astype(cd))
    w2_p = jnp.zeros((d_pad, d_pad), cd).at[:nhid, :nclass].set(w2.astype(cd))
    b1_p = jnp.zeros((1, d_pad), jnp.float32).at[0, :nhid].set(b1.astype(jnp.float32))
    b2_p = jnp.zeros((1, d_pad), jnp.float32).at[0, :nclass].set(b2.astype(jnp.float32))

    grid = (2, n_pad // tm, n_pad // tk)

    # ---- VMEM budget / cost hints -----------------------------------------
    itm = jnp.dtype(cd).itemsize
    vmem_need = (2 * tm * tk * itm                 # adj tiles (double-buffered)
                 + 2 * n_pad * f_pad * itm         # x (resident)
                 + 2 * f_pad * d_pad * itm         # W1
                 + 2 * d_pad * d_pad * itm         # W2
                 + 4 * d_pad * 4                   # biases
                 + 2 * tm * d_pad * 4              # output tile (double-buffered)
                 + 2 * n_pad * d_pad * itm         # support + h scratch
                 + tm * d_pad * 4)                 # f32 accumulator
    vmem_limit = int(min(max(vmem_need + vmem_need // 2 + (4 << 20), 32 << 20),
                         64 << 20))

    flops = int(2 * n_pad * f_pad * d_pad          # x @ W1
                + 2 * n_pad * d_pad * d_pad        # h @ W2
                + 2 * 2 * n_pad * n_pad * d_pad)   # adj @ support, twice
    bytes_accessed = int(2 * n_pad * n_pad * itm   # adj streamed once per layer
                         + n_pad * f_pad * itm
                         + (f_pad + d_pad) * d_pad * itm
                         + n_pad * d_pad * 4)

    kernel = functools.partial(_fused_gcn_kernel, tm=tm, tk=tk)

    y_pad = pl.pallas_call(
        kernel,
        out_shape=jax.ShapeDtypeStruct((n_pad, d_pad), jnp.float32),
        grid_spec=pltpu.PrefetchScalarGridSpec(
            num_scalar_prefetch=0,
            grid=grid,
            in_specs=[
                pl.BlockSpec((tm, tk), lambda l, i, k: (i, k)),        # adj tile
                pl.BlockSpec((n_pad, f_pad), lambda l, i, k: (0, 0)),  # x (resident)
                pl.BlockSpec((f_pad, d_pad), lambda l, i, k: (0, 0)),  # W1
                pl.BlockSpec((1, d_pad), lambda l, i, k: (0, 0)),      # b1
                pl.BlockSpec((d_pad, d_pad), lambda l, i, k: (0, 0)),  # W2
                pl.BlockSpec((1, d_pad), lambda l, i, k: (0, 0)),      # b2
            ],
            # During layer 0 the output block index stays at (0, 0) so no stale
            # writeback happens; during layer 1 it tracks the row tile.
            out_specs=pl.BlockSpec((tm, d_pad), lambda l, i, k: (i * l, 0)),
            scratch_shapes=[
                pltpu.VMEM((n_pad, d_pad), cd),           # support (x@W1 / h@W2)
                pltpu.VMEM((n_pad, d_pad), cd),           # h = relu(gc1 output)
                pltpu.VMEM((tm, d_pad), jnp.float32),     # row-tile accumulator
            ]),
        compiler_params=pltpu.CompilerParams(
            dimension_semantics=("arbitrary", "arbitrary", "arbitrary"),
            vmem_limit_bytes=vmem_limit),
        cost_estimate=pl.CostEstimate(flops=flops, transcendentals=0,
                                      bytes_accessed=bytes_accessed),
    )(adj_p, x_p, w1_p, b1_p, w2_p, b2_p)

    return y_pad[:n, :nclass]


gcn_forward = jax.jit(_gcn_forward_impl)


def init_gcn_params(key, nfeat, nhid, nclass):
    """Matches GraphConvolution.reset_parameters: U(-stdv, stdv), stdv=1/sqrt(out)."""
    k1, k2, k3, k4 = jax.random.split(key, 4)
    stdv1 = 1.0 / math.sqrt(nhid)
    stdv2 = 1.0 / math.sqrt(nclass)
    w1 = jax.random.uniform(k1, (nfeat, nhid), jnp.float32, -stdv1, stdv1)
    b1 = jax.random.uniform(k2, (nhid,), jnp.float32, -stdv1, stdv1)
    w2 = jax.random.uniform(k3, (nhid, nclass), jnp.float32, -stdv2, stdv2)
    b2 = jax.random.uniform(k4, (nclass,), jnp.float32, -stdv2, stdv2)
    return (w1, b1), (w2, b2)


if __name__ == "__main__":
    # Small synthetic graph consistent with the module's forward.
    N = 64       # nodes (docs + words in TextGCN)
    NFEAT = 32   # input feature dim
    NHID = 16    # hidden dim
    NCLASS = 8   # number of classes

    key = jax.random.PRNGKey(0)
    k_adj, k_x, k_params = jax.random.split(key, 3)

    # Dense row-normalized adjacency (stand-in for the dense-ified sparse PMI/TF-IDF).
    a = jax.random.uniform(k_adj, (N, N), jnp.float32)
    a = (a + a.T) * 0.5 + jnp.eye(N, dtype=jnp.float32)
    adj = a / jnp.sum(a, axis=1, keepdims=True)

    x = jax.random.normal(k_x, (N, NFEAT), jnp.float32)
    (w1, b1), (w2, b2) = init_gcn_params(k_params, NFEAT, NHID, NCLASS)

    out = gcn_forward(x, adj, w1, b1, w2, b2)
    out = jax.block_until_ready(out)
    assert out.shape == (N, NCLASS)

    # Reference 1: mirror the kernel's bf16-stream / f32-accumulate precision.
    f32 = jnp.float32
    adj_b = adj.astype(jnp.bfloat16).astype(f32)
    x_b = x.astype(jnp.bfloat16).astype(f32)
    w1_b = w1.astype(jnp.bfloat16).astype(f32)
    w2_b = w2.astype(jnp.bfloat16).astype(f32)
    sup1 = (x_b @ w1_b).astype(jnp.bfloat16).astype(f32)
    ref_h = jnp.maximum(adj_b @ sup1 + b1, 0.0).astype(jnp.bfloat16).astype(f32)
    sup2 = (ref_h @ w2_b).astype(jnp.bfloat16).astype(f32)
    ref_y_bf16 = adj_b @ sup2 + b2
    assert jnp.allclose(out, ref_y_bf16, atol=5e-3, rtol=5e-3)

    # Reference 2: pure f32 math (looser tolerance due to bf16 streaming).
    ref_h32 = jnp.maximum(adj @ (x @ w1) + b1, 0.0)
    ref_y32 = adj @ (ref_h32 @ w2) + b2
    assert jnp.allclose(out, ref_y32, atol=5e-2, rtol=5e-2)

    print("KERNEL_OK")
</pallas_src>

<mosaic_0001>
module attributes {stable_mosaic.version = 11 : i64} {
  func.func @_fused_gcn_kernel(%arg0: i32, %arg1: i32, %arg2: i32, %arg3: memref<128x128xbf16, #tpu.memory_space<vmem>>, %arg4: memref<128x128xbf16, #tpu.memory_space<vmem>>, %arg5: memref<128x128xbf16, #tpu.memory_space<vmem>>, %arg6: memref<1x128xf32, #tpu.memory_space<vmem>>, %arg7: memref<128x128xbf16, #tpu.memory_space<vmem>>, %arg8: memref<1x128xf32, #tpu.memory_space<vmem>>, %arg9: memref<128x128xf32, #tpu.memory_space<vmem>>, %arg10: memref<128x128xbf16, #tpu.memory_space<vmem>>, %arg11: memref<128x128xbf16, #tpu.memory_space<vmem>>, %arg12: memref<128x128xf32, #tpu.memory_space<vmem>>) attributes {dimension_semantics = [#tpu.dimension_semantics<arbitrary>, #tpu.dimension_semantics<arbitrary>, #tpu.dimension_semantics<arbitrary>], iteration_bounds = array<i64: 2, 1, 1>, scalar_prefetch = 0 : i64, scratch_operands = 3 : i64, tpu.core_type = #tpu.core_type<tc>, window_params = [{transform_indices = @transform_0, window_bounds = array<i64: 128, 128>}, {pipeline_mode = #tpu.pipeline_mode<synchronous>, transform_indices = @transform_1, window_bounds = array<i64: 128, 128>}, {pipeline_mode = #tpu.pipeline_mode<synchronous>, transform_indices = @transform_2, window_bounds = array<i64: 128, 128>}, {pipeline_mode = #tpu.pipeline_mode<synchronous>, transform_indices = @transform_3, window_bounds = array<i64: 1, 128>}, {pipeline_mode = #tpu.pipeline_mode<synchronous>, transform_indices = @transform_4, window_bounds = array<i64: 128, 128>}, {pipeline_mode = #tpu.pipeline_mode<synchronous>, transform_indices = @transform_5, window_bounds = array<i64: 1, 128>}, {transform_indices = @transform_6, window_bounds = array<i64: 128, 128>}]} {
    %c0_i32 = arith.constant 0 : i32
    %0 = arith.cmpi eq, %arg1, %c0_i32 : i32
    %c0_i32_0 = arith.constant 0 : i32
    %1 = arith.cmpi eq, %arg2, %c0_i32_0 : i32
    %2 = arith.andi %0, %1 : i1
    %3 = arith.extui %2 : i1 to i32
    %c0_i32_1 = arith.constant 0 : i32
    %4 = arith.cmpi ne, %3, %c0_i32_1 : i32
    scf.if %4 {
      %c0_i32_12 = arith.constant 0 : i32
      %20 = arith.cmpi eq, %arg0, %c0_i32_12 : i32
      %21 = arith.extui %20 : i1 to i32
      %c0_i32_13 = arith.constant 0 : i32
      %22 = arith.cmpi ne, %21, %c0_i32_13 : i32
      scf.if %22 {
        %c0_15 = arith.constant 0 : index
        %c0_16 = arith.constant 0 : index
        %26 = vector.load %arg4[%c0_15, %c0_16] : memref<128x128xbf16, #tpu.memory_space<vmem>>, vector<128x128xbf16>
        %c0_17 = arith.constant 0 : index
        %c0_18 = arith.constant 0 : index
        %27 = vector.load %arg5[%c0_17, %c0_18] : memref<128x128xbf16, #tpu.memory_space<vmem>>, vector<128x128xbf16>
        %cst_19 = arith.constant dense<0.000000e+00> : vector<128x128xf32>
        %28 = tpu.matmul %26, %27, %cst_19 {dimension_numbers = #tpu.dot_dimension_numbers<[1], [0], [0], [1], [0, 0, 1, 1], [], []>} : vector<128x128xbf16>, vector<128x128xbf16>, vector<128x128xf32> -> vector<128x128xf32>
        %29 = arith.truncf %28 : vector<128x128xf32> to vector<128x128xbf16>
        %c0_20 = arith.constant 0 : index
        %c0_21 = arith.constant 0 : index
        %30 = vector.load %arg10[%c0_20, %c0_21] : memref<128x128xbf16, #tpu.memory_space<vmem>>, vector<128x128xbf16>
        tpu.vector_store %arg10[%c0_20, %c0_21], %29 {strides = array<i32>} : memref<128x128xbf16, #tpu.memory_space<vmem>>, vector<128x128xbf16>,
      } else {
      }
      %c1_i32 = arith.constant 1 : i32
      %23 = arith.cmpi eq, %arg0, %c1_i32 : i32
      %24 = arith.extui %23 : i1 to i32
      %c0_i32_14 = arith.constant 0 : i32
      %25 = arith.cmpi ne, %24, %c0_i32_14 : i32
      scf.if %25 {
        %c0_15 = arith.constant 0 : index
        %c0_16 = arith.constant 0 : index
        %26 = vector.load %arg11[%c0_15, %c0_16] : memref<128x128xbf16, #tpu.memory_space<vmem>>, vector<128x128xbf16>
        %c0_17 = arith.constant 0 : index
        %c0_18 = arith.constant 0 : index
        %27 = vector.load %arg7[%c0_17, %c0_18] : memref<128x128xbf16, #tpu.memory_space<vmem>>, vector<128x128xbf16>
        %cst_19 = arith.constant dense<0.000000e+00> : vector<128x128xf32>
        %28 = tpu.matmul %26, %27, %cst_19 {dimension_numbers = #tpu.dot_dimension_numbers<[1], [0], [0], [1], [0, 0, 1, 1], [], []>} : vector<128x128xbf16>, vector<128x128xbf16>, vector<128x128xf32> -> vector<128x128xf32>
        %29 = arith.truncf %28 : vector<128x128xf32> to vector<128x128xbf16>
        %c0_20 = arith.constant 0 : index
        %c0_21 = arith.constant 0 : index
        %30 = vector.load %arg10[%c0_20, %c0_21] : memref<128x128xbf16, #tpu.memory_space<vmem>>, vector<128x128xbf16>
        tpu.vector_store %arg10[%c0_20, %c0_21], %29 {strides = array<i32>} : memref<128x128xbf16, #tpu.memory_space<vmem>>, vector<128x128xbf16>,
      } else {
      }
    } else {
    }
    %c0_i32_2 = arith.constant 0 : i32
    %5 = arith.cmpi eq, %arg2, %c0_i32_2 : i32
    %6 = arith.extui %5 : i1 to i32
    %c0_i32_3 = arith.constant 0 : i32
    %7 = arith.cmpi ne, %6, %c0_i32_3 : i32
    scf.if %7 {
      %cst_12 = arith.constant 0.000000e+00 : f32
      %20 = vector.broadcast %cst_12 : f32 to vector<128x128xf32>
      %c0_13 = arith.constant 0 : index
      %c0_14 = arith.constant 0 : index
      %21 = vector.load %arg12[%c0_13, %c0_14] : memref<128x128xf32, #tpu.memory_space<vmem>>, vector<128x128xf32>
      tpu.vector_store %arg12[%c0_13, %c0_14], %20 {strides = array<i32>} : memref<128x128xf32, #tpu.memory_space<vmem>>, vector<128x128xf32>,
    } else {
    }
    %c128_i32 = arith.constant 128 : i32
    %8 = arith.muli %arg2, %c128_i32 : i32
    %9 = tpu.assume_multiple %8, 128 : i32
    %c0 = arith.constant 0 : index
    %c0_4 = arith.constant 0 : index
    %10 = vector.load %arg12[%c0, %c0_4] : memref<128x128xf32, #tpu.memory_space<vmem>>, vector<128x128xf32>
    %c0_5 = arith.constant 0 : index
    %c0_6 = arith.constant 0 : index
    %11 = vector.load %arg3[%c0_5, %c0_6] : memref<128x128xbf16, #tpu.memory_space<vmem>>, vector<128x128xbf16>
    %12 = arith.index_cast %9 : i32 to index
    %c0_7 = arith.constant 0 : index
    %13 = vector.load %arg10[%12, %c0_7] : memref<128x128xbf16, #tpu.memory_space<vmem>>, vector<128x128xbf16>
    %cst = arith.constant dense<0.000000e+00> : vector<128x128xf32>
    %14 = tpu.matmul %11, %13, %cst {dimension_numbers = #tpu.dot_dimension_numbers<[1], [0], [0], [1], [0, 0, 1, 1], [], []>} : vector<128x128xbf16>, vector<128x128xbf16>, vector<128x128xf32> -> vector<128x128xf32>
    %15 = arith.addf %10, %14 : vector<128x128xf32>
    %c0_8 = arith.constant 0 : index
    %c0_9 = arith.constant 0 : index
    %16 = vector.load %arg12[%c0_8, %c0_9] : memref<128x128xf32, #tpu.memory_space<vmem>>, vector<128x128xf32>
    tpu.vector_store %arg12[%c0_8, %c0_9], %15 {strides = array<i32>} : memref<128x128xf32, #tpu.memory_space<vmem>>, vector<128x128xf32>,
    %c0_i32_10 = arith.constant 0 : i32
    %17 = arith.cmpi eq, %arg2, %c0_i32_10 : i32
    %18 = arith.extui %17 : i1 to i32
    %c0_i32_11 = arith.constant 0 : i32
    %19 = arith.cmpi ne, %18, %c0_i32_11 : i32
    scf.if %19 {
      %c0_i32_12 = arith.constant 0 : i32
      %20 = arith.cmpi eq, %arg0, %c0_i32_12 : i32
      %21 = arith.extui %20 : i1 to i32
      %c0_i32_13 = arith.constant 0 : i32
      %22 = arith.cmpi ne, %21, %c0_i32_13 : i32
      scf.if %22 {
        %c0_15 = arith.constant 0 : index
        %c0_16 = arith.constant 0 : index
        %26 = vector.load %arg12[%c0_15, %c0_16] : memref<128x128xf32, #tpu.memory_space<vmem>>, vector<128x128xf32>
        %c0_17 = arith.constant 0 : index
        %c0_18 = arith.constant 0 : index
        %27 = vector.load %arg6[%c0_17, %c0_18] : memref<1x128xf32, #tpu.memory_space<vmem>>, vector<1x128xf32>
        %28 = vector.broadcast %27 : vector<1x128xf32> to vector<128x128xf32>
        %29 = arith.addf %26, %28 : vector<128x128xf32>
        %cst_19 = arith.constant 0.000000e+00 : f32
        %30 = vector.broadcast %cst_19 : f32 to vector<128x128xf32>
        %31 = arith.maximumf %29, %30 : vector<128x128xf32>
        %c128_i32_20 = arith.constant 128 : i32
        %32 = arith.muli %arg1, %c128_i32_20 : i32
        %33 = tpu.assume_multiple %32, 128 : i32
        %34 = arith.truncf %31 : vector<128x128xf32> to vector<128x128xbf16>
        %35 = arith.index_cast %33 : i32 to index
        %c0_21 = arith.constant 0 : index
        %36 = vector.load %arg11[%35, %c0_21] : memref<128x128xbf16, #tpu.memory_space<vmem>>, vector<128x128xbf16>
        tpu.vector_store %arg11[%35, %c0_21], %34 {strides = array<i32>} : memref<128x128xbf16, #tpu.memory_space<vmem>>, vector<128x128xbf16>,
      } else {
      }
      %c1_i32 = arith.constant 1 : i32
      %23 = arith.cmpi eq, %arg0, %c1_i32 : i32
      %24 = arith.extui %23 : i1 to i32
      %c0_i32_14 = arith.constant 0 : i32
      %25 = arith.cmpi ne, %24, %c0_i32_14 : i32
      scf.if %25 {
        %c0_15 = arith.constant 0 : index
        %c0_16 = arith.constant 0 : index
        %26 = vector.load %arg12[%c0_15, %c0_16] : memref<128x128xf32, #tpu.memory_space<vmem>>, vector<128x128xf32>
        %c0_17 = arith.constant 0 : index
        %c0_18 = arith.constant 0 : index
        %27 = vector.load %arg8[%c0_17, %c0_18] : memref<1x128xf32, #tpu.memory_space<vmem>>, vector<1x128xf32>
        %28 = vector.broadcast %27 : vector<1x128xf32> to vector<128x128xf32>
        %29 = arith.addf %26, %28 : vector<128x128xf32>
        %c0_19 = arith.constant 0 : index
        %c0_20 = arith.constant 0 : index
        %30 = vector.load %arg9[%c0_19, %c0_20] : memref<128x128xf32, #tpu.memory_space<vmem>>, vector<128x128xf32>
        tpu.vector_store %arg9[%c0_19, %c0_20], %29 {strides = array<i32>} : memref<128x128xf32, #tpu.memory_space<vmem>>, vector<128x128xf32>,
      } else {
      }
    } else {
    }
    return
  }
  func.func @transform_0(%arg0: i32, %arg1: i32, %arg2: i32) -> (i32, i32) {
    %c0_i32 = arith.constant 0 : i32
    return %arg1, %arg2 : i32, i32
  }
  func.func @transform_1(%arg0: i32, %arg1: i32, %arg2: i32) -> (i32, i32) {
    %c0_i32 = arith.constant 0 : i32
    %c0_i32_0 = arith.constant 0 : i32
    %c0_i32_1 = arith.constant 0 : i32
    return %c0_i32, %c0_i32_0 : i32, i32
  }
  func.func @transform_2(%arg0: i32, %arg1: i32, %arg2: i32) -> (i32, i32) {
    %c0_i32 = arith.constant 0 : i32
    %c0_i32_0 = arith.constant 0 : i32
    %c0_i32_1 = arith.constant 0 : i32
    return %c0_i32, %c0_i32_0 : i32, i32
  }
  func.func @transform_3(%arg0: i32, %arg1: i32, %arg2: i32) -> (i32, i32) {
    %c0_i32 = arith.constant 0 : i32
    %c0_i32_0 = arith.constant 0 : i32
    %c0_i32_1 = arith.constant 0 : i32
    return %c0_i32, %c0_i32_0 : i32, i32
  }
  func.func @transform_4(%arg0: i32, %arg1: i32, %arg2: i32) -> (i32, i32) {
    %c0_i32 = arith.constant 0 : i32
    %c0_i32_0 = arith.constant 0 : i32
    %c0_i32_1 = arith.constant 0 : i32
    return %c0_i32, %c0_i32_0 : i32, i32
  }
  func.func @transform_5(%arg0: i32, %arg1: i32, %arg2: i32) -> (i32, i32) {
    %c0_i32 = arith.constant 0 : i32
    %c0_i32_0 = arith.constant 0 : i32
    %c0_i32_1 = arith.constant 0 : i32
    return %c0_i32, %c0_i32_0 : i32, i32
  }
  func.func @transform_6(%arg0: i32, %arg1: i32, %arg2: i32) -> (i32, i32) {
    %0 = arith.muli %arg1, %arg0 : i32
    %c0_i32 = arith.constant 0 : i32
    %c0_i32_0 = arith.constant 0 : i32
    return %0, %c0_i32 : i32, i32
  }
}

</mosaic_0001>

<bundles_post_ra>
// kernel: _gcn_forward_impl.1
= control target key start
LH: loop header
LB: loop body
LE: loop exit
PB: predicated region body
PF: predicated region fallthrough
CT: control target
= control target key end

     0   :  { %s1756_s21 = smov 0   ;;  %s1758_s22 = smov 0   ;;  %s1945_s0 = inlined_call_operand.vmem [shape: bf16[128,128], index: 0, kind: input, shape index: {}]   ;;  %s1946_s1 = inlined_call_operand.vmem [shape: bf16[128,128], index: 1, kind: input, shape index: {}]   ;;  %s1947_s2 = inlined_call_operand.vmem [shape: bf16[128,128], index: 2, kind: input, shape index: {}]   ;;  %s1948_s3 = inlined_call_operand.vmem [shape: f32[1,128], index: 3, kind: input, shape index: {}]   ;;  %s1949_s4 = inlined_call_operand.vmem [shape: bf16[128,128], index: 4, kind: input, shape index: {}]   ;;  %s1950_s5 = inlined_call_operand.vmem [shape: f32[1,128], index: 5, kind: input, shape index: {}]   ;;  %s1951_s6 = inlined_call_operand.vmem [shape: f32[128,128], index: 6, kind: output, shape index: {}]  }
   0x1   :  { %s1760_s23 = smov 0  }
   0x2 LB: > { %s35_s24 = sadd.s32 1, %s1715_s22  ;;  %p1208_p0 = scmp.ge.s32.totalorder %s1719_s23, 1  ;;  %s1719_s23 = sphi %s1760_s23, %s16_s23   ;;  %s1715_s22 = sphi %s1758_s22, %s1953_s22   ;;  %s1711_s21 = sphi %s1756_s21, %s1952_s21  }
   0x3   : > { %p37_p1 = scmp.ge.s32.totalorder %s35_s24, 2  ;;  %p239_p2 = scmp.lt.s32.totalorder %s1719_s23, 3 }
   0x5   : > { %s1955_s24 = smov (%p37_p1, %s35_s24), 0  ;;  %p240_p3 = pnand %p1208_p0, %p239_p2 }
   0x6   : > { %p1209_p4 = scmp.ne.s32.totalorder (!%p240_p3), %s1711_s21, 0 }
   0x7   : > { %243 = sbr.rel (%p240_p3) target bundleno = 647 (0x287), region = 44 }
   0xc   : > { %299 = sbr.rel (%p1209_p4) target bundleno = 210 (0xd2), region = 52 }
  0x11   : > { %v1424_v0 = vld [vmem:[%s1947_s2 + $0x38] sm:$0xff]  ;;  %v1423_v1 = vld [vmem:[%s1947_s2 + $0x30] sm:$0xff]  ;;  %v1422_v2 = vld [vmem:[%s1947_s2 + $0x28] sm:$0xff] }
  0x12   : > { %428 = vmatpush.bf16.msra.mxu0 %v1424_v0  ;;  %1598 = vmatpush.bf16.msra.mxu1 %v1424_v0  ;;  %v1421_v3 = vld [vmem:[%s1947_s2 + $0x20] sm:$0xff]  ;;  %v1420_v4 = vld [vmem:[%s1947_s2 + $0x18] sm:$0xff]  ;;  %v1419_v5 = vld [vmem:[%s1947_s2 + $0x10] sm:$0xff] }
  0x13   : > { %1599 = vmatpush.bf16.msra.mxu2 %v1424_v0  ;;  %1600 = vmatpush.bf16.msra.mxu3 %v1424_v0  ;;  %v1418_v6 = vld [vmem:[%s1947_s2 + $0x8] sm:$0xff]  ;;  %v1417_v7 = vld [vmem:[%s1947_s2] sm:$0xff]  ;;  %v1411_v9 = vld [vmem:[%s1946_s1 + $0x10] sm:$0xff] }
  0x14   : > { %v1409_v8 = vld [vmem:[%s1946_s1] sm:$0xff]  ;;  %v1415_v11 = vld [vmem:[%s1946_s1 + $0x30] sm:$0xff]  ;;  %v1410_v12 = vld [vmem:[%s1946_s1 + $0x8] sm:$0xff] }
  0x15   : > { %v1413_v10 = vld [vmem:[%s1946_s1 + $0x20] sm:$0xff]  ;;  %v1412_v13 = vld [vmem:[%s1946_s1 + $0x18] sm:$0xff]  ;;  %v1414_v14 = vld [vmem:[%s1946_s1 + $0x28] sm:$0xff] }
  0x16   : > { %429 = vmatpush.bf16.msra.mxu0 %v1423_v1  ;;  %1601 = vmatpush.bf16.msra.mxu1 %v1423_v1  ;;  %v1416_v15 = vld [vmem:[%s1946_s1 + $0x38] sm:$0xff] }
  0x17   : > { %1602 = vmatpush.bf16.msra.mxu2 %v1423_v1  ;;  %1603 = vmatpush.bf16.msra.mxu3 %v1423_v1 }
  0x1a   : > { %430 = vmatpush.bf16.msra.mxu0 %v1422_v2  ;;  %1604 = vmatpush.bf16.msra.mxu1 %v1422_v2 }
  0x1b   : > { %1605 = vmatpush.bf16.msra.mxu2 %v1422_v2  ;;  %1606 = vmatpush.bf16.msra.mxu3 %v1422_v2 }
  0x1e   : > { %431 = vmatpush.bf16.msra.mxu0 %v1421_v3  ;;  %1607 = vmatpush.bf16.msra.mxu1 %v1421_v3 }
  0x1f   : > { %1608 = vmatpush.bf16.msra.mxu2 %v1421_v3  ;;  %1609 = vmatpush.bf16.msra.mxu3 %v1421_v3 }
  0x22   : > { %432 = vmatpush.bf16.msra.mxu0 %v1420_v4  ;;  %1610 = vmatpush.bf16.msra.mxu1 %v1420_v4 }
  0x23   : > { %1611 = vmatpush.bf16.msra.mxu2 %v1420_v4  ;;  %1612 = vmatpush.bf16.msra.mxu3 %v1420_v4 }
  0x26   : > { %433 = vmatpush.bf16.msra.mxu0 %v1419_v5  ;;  %1613 = vmatpush.bf16.msra.mxu1 %v1419_v5 }
  0x27   : > { %1614 = vmatpush.bf16.msra.mxu2 %v1419_v5  ;;  %1615 = vmatpush.bf16.msra.mxu3 %v1419_v5 }
  0x2a   : > { %434 = vmatpush.bf16.msra.mxu0 %v1418_v6  ;;  %1616 = vmatpush.bf16.msra.mxu1 %v1418_v6 }
  0x2b   : > { %1617 = vmatpush.bf16.msra.mxu2 %v1418_v6  ;;  %1618 = vmatpush.bf16.msra.mxu3 %v1418_v6 }
  0x2e   : > { %435 = vmatpush.bf16.msra.mxu0 %v1417_v7  ;;  %1619 = vmatpush.bf16.msra.mxu1 %v1417_v7 }
  0x2f   : > { %1620 = vmatpush.bf16.msra.mxu2 %v1417_v7  ;;  %1621 = vmatpush.bf16.msra.mxu3 %v1417_v7 }
  0x31   : > { %436 = vmatmul.bf16.vlgmr.msra.gmra.mxu0 %v1409_v8  ;;  %446 = vmatmul.bf16.vlgmr.msra.gmra.mxu1 %v1411_v9 }
  0x32   : > { %456 = vmatmul.bf16.vlgmr.msra.gmra.mxu2 %v1413_v10  ;;  %466 = vmatmul.bf16.vlgmr.msra.gmra.mxu3 %v1415_v11 }
  0x41   : > { %441 = vmatmul.bf16.gmra.mxu0 %v1410_v12  ;;  %451 = vmatmul.bf16.gmra.mxu1 %v1412_v13 }
  0x42   : > { %461 = vmatmul.bf16.gmra.mxu2 %v1414_v14  ;;  %471 = vmatmul.bf16.gmra.mxu3 %v1416_v15 }
  0xae   : > { %v437_v16 = vpop.f32.mrf.mxu0  ;;  %v447_v17 = vpop.f32.mrf.mxu1 }
  0xb5   : > { %v457_v18 = vpop.f32.mrf.mxu2  ;;  %v467_v19 = vpop.f32.mrf.mxu3 }
  0xb6   : > { %v439_v20 = vpop.f32.mrf.mxu0  ;;  %v449_v21 = vpop.f32.mrf.mxu1 }
  0xb7   : > { %v1460_v22 = vpack.c.bf16 %v439_v20, %v437_v16  ;;  %v1470_v23 = vpack.c.bf16 %v449_v21, %v447_v17 }
  0xb9   : > { %1461 = vst [vmem:[#allocation2 + $0x30] sm:$0xff] %v1460_v22  }
  0xba   : > { %1578 = vst [vmem:[#allocation2 + $0x18] sm:$0xff] %v1470_v23  }
  0xbd   : > { %v459_v24 = vpop.f32.mrf.mxu2  ;;  %v469_v25 = vpop.f32.mrf.mxu3 }
  0xbe   : > { %v1480_v26 = vpack.c.bf16 %v459_v24, %v457_v18  ;;  %v1490_v27 = vpack.c.bf16 %v469_v25, %v467_v19  ;;  %v442_v28 = vpop.f32.mrf.mxu0  ;;  %v452_v29 = vpop.f32.mrf.mxu1 }
  0xc0   : > { %1580 = vst [vmem:[#allocation2 + $0x8] sm:$0xff] %v1480_v26  }
  0xc1   : > { %1582 = vst [vmem:[#allocation2 + $0x28] sm:$0xff] %v1490_v27  }
  0xc5   : > { %v462_v30 = vpop.f32.mrf.mxu2  ;;  %v472_v31 = vpop.f32.mrf.mxu3 }
  0xc6   : > { %v444_v32 = vpop.f32.mrf.mxu0  ;;  %v454_v33 = vpop.f32.mrf.mxu1 }
  0xc7   : > { %v1465_v34 = vpack.c.bf16 %v444_v32, %v442_v28  ;;  %v1475_v35 = vpack.c.bf16 %v454_v33, %v452_v29 }
  0xc9   : > { %1577 = vst [vmem:[#allocation2] sm:$0xff] %v1465_v34  }
  0xca   : > { %1579 = vst [vmem:[#allocation2 + $0x10] sm:$0xff] %v1475_v35  }
  0xcd   : > { %v464_v36 = vpop.f32.mrf.mxu2  ;;  %v474_v37 = vpop.f32.mrf.mxu3 }
  0xce   : > { %v1485_v38 = vpack.c.bf16 %v464_v36, %v462_v30  ;;  %v1495_v39 = vpack.c.bf16 %v474_v37, %v472_v31 }
  0xd0   : > { %1581 = vst [vmem:[#allocation2 + $0x20] sm:$0xff] %v1485_v38  }
  0xd1   : > { %1583 = vst [vmem:[#allocation2 + $0x38] sm:$0xff] %v1495_v39  }
  0xd2 PF: > { %p1274_p5 = scmp.ne.s32.totalorder %s1711_s21, 1 }
  0xd4   : > { %512 = sbr.rel (%p1274_p5) target bundleno = 410 (0x19a), region = 56 }
  0xd9   : > { %v1440_v40 = vld [vmem:[%s1949_s4 + $0x38] sm:$0xff]  ;;  %v1439_v41 = vld [vmem:[%s1949_s4 + $0x30] sm:$0xff]  ;;  %v1438_v42 = vld [vmem:[%s1949_s4 + $0x28] sm:$0xff] }
  0xda   : > { %641 = vmatpush.bf16.msra.mxu0 %v1440_v40  ;;  %1622 = vmatpush.bf16.msra.mxu1 %v1440_v40  ;;  %v1437_v43 = vld [vmem:[%s1949_s4 + $0x20] sm:$0xff]  ;;  %v1436_v44 = vld [vmem:[%s1949_s4 + $0x18] sm:$0xff]  ;;  %v1435_v45 = vld [vmem:[%s1949_s4 + $0x10] sm:$0xff] }
  0xdb   : > { %1623 = vmatpush.bf16.msra.mxu2 %v1440_v40  ;;  %1624 = vmatpush.bf16.msra.mxu3 %v1440_v40  ;;  %v1434_v46 = vld [vmem:[%s1949_s4 + $0x8] sm:$0xff]  ;;  %v1433_v47 = vld [vmem:[%s1949_s4] sm:$0xff]  ;;  %v1427_v49 = vld [vmem:[#allocation3 + $0x10] sm:$0xff] }
  0xdc   : > { %v1425_v48 = vld [vmem:[#allocation3] sm:$0xff]  ;;  %v1429_v50 = vld [vmem:[#allocation3 + $0x28] sm:$0xff]  ;;  %v1431_v51 = vld [vmem:[#allocation3 + $0x30] sm:$0xff] }
  0xdd   : > { %v1426_v52 = vld [vmem:[#allocation3 + $0x18] sm:$0xff]  ;;  %v1428_v53 = vld [vmem:[#allocation3 + $0x20] sm:$0xff]  ;;  %v1430_v54 = vld [vmem:[#allocation3 + $0x8] sm:$0xff] }
  0xde   : > { %642 = vmatpush.bf16.msra.mxu0 %v1439_v41  ;;  %1625 = vmatpush.bf16.msra.mxu1 %v1439_v41  ;;  %v1432_v55 = vld [vmem:[#allocation3 + $0x38] sm:$0xff] }
  0xdf   : > { %1626 = vmatpush.bf16.msra.mxu2 %v1439_v41  ;;  %1627 = vmatpush.bf16.msra.mxu3 %v1439_v41 }
  0xe2   : > { %643 = vmatpush.bf16.msra.mxu0 %v1438_v42  ;;  %1628 = vmatpush.bf16.msra.mxu1 %v1438_v42 }
  0xe3   : > { %1629 = vmatpush.bf16.msra.mxu2 %v1438_v42  ;;  %1630 = vmatpush.bf16.msra.mxu3 %v1438_v42 }
  0xe6   : > { %644 = vmatpush.bf16.msra.mxu0 %v1437_v43  ;;  %1631 = vmatpush.bf16.msra.mxu1 %v1437_v43 }
  0xe7   : > { %1632 = vmatpush.bf16.msra.mxu2 %v1437_v43  ;;  %1633 = vmatpush.bf16.msra.mxu3 %v1437_v43 }
  0xea   : > { %645 = vmatpush.bf16.msra.mxu0 %v1436_v44  ;;  %1634 = vmatpush.bf16.msra.mxu1 %v1436_v44 }
  0xeb   : > { %1635 = vmatpush.bf16.msra.mxu2 %v1436_v44  ;;  %1636 = vmatpush.bf16.msra.mxu3 %v1436_v44 }
  0xee   : > { %646 = vmatpush.bf16.msra.mxu0 %v1435_v45  ;;  %1637 = vmatpush.bf16.msra.mxu1 %v1435_v45 }
  0xef   : > { %1638 = vmatpush.bf16.msra.mxu2 %v1435_v45  ;;  %1639 = vmatpush.bf16.msra.mxu3 %v1435_v45 }
  0xf2   : > { %647 = vmatpush.bf16.msra.mxu0 %v1434_v46  ;;  %1640 = vmatpush.bf16.msra.mxu1 %v1434_v46 }
  0xf3   : > { %1641 = vmatpush.bf16.msra.mxu2 %v1434_v46  ;;  %1642 = vmatpush.bf16.msra.mxu3 %v1434_v46 }
  0xf6   : > { %648 = vmatpush.bf16.msra.mxu0 %v1433_v47  ;;  %1643 = vmatpush.bf16.msra.mxu1 %v1433_v47 }
  0xf7   : > { %1644 = vmatpush.bf16.msra.mxu2 %v1433_v47  ;;  %1645 = vmatpush.bf16.msra.mxu3 %v1433_v47 }
  0xf9   : > { %649 = vmatmul.bf16.vlgmr.msra.gmra.mxu0 %v1425_v48  ;;  %659 = vmatmul.bf16.vlgmr.msra.gmra.mxu1 %v1427_v49 }
  0xfa   : > { %669 = vmatmul.bf16.vlgmr.msra.gmra.mxu2 %v1429_v50  ;;  %679 = vmatmul.bf16.vlgmr.msra.gmra.mxu3 %v1431_v51 }
 0x109   : > { %654 = vmatmul.bf16.gmra.mxu0 %v1426_v52  ;;  %664 = vmatmul.bf16.gmra.mxu1 %v1428_v53 }
 0x10a   : > { %674 = vmatmul.bf16.gmra.mxu2 %v1430_v54  ;;  %684 = vmatmul.bf16.gmra.mxu3 %v1432_v55 }
 0x176   : > { %v650_v56 = vpop.f32.mrf.mxu0  ;;  %v660_v57 = vpop.f32.mrf.mxu1 }
 0x17d   : > { %v670_v58 = vpop.f32.mrf.mxu2  ;;  %v680_v59 = vpop.f32.mrf.mxu3 }
 0x17e   : > { %v652_v60 = vpop.f32.mrf.mxu0  ;;  %v662_v61 = vpop.f32.mrf.mxu1 }
 0x17f   : > { %v1500_v62 = vpack.c.bf16 %v652_v60, %v650_v56  ;;  %v1510_v63 = vpack.c.bf16 %v662_v61, %v660_v57 }
 0x181   : > { %1501 = vst [vmem:[#allocation2 + $0x30] sm:$0xff] %v1500_v62  }
 0x182   : > { %1585 = vst [vmem:[#allocation2 + $0x18] sm:$0xff] %v1510_v63  }
 0x185   : > { %v672_v0 = vpop.f32.mrf.mxu2  ;;  %v682_v1 = vpop.f32.mrf.mxu3 }
 0x186   : > { %v1520_v2 = vpack.c.bf16 %v672_v0, %v670_v58  ;;  %v1530_v3 = vpack.c.bf16 %v682_v1, %v680_v59  ;;  %v655_v4 = vpop.f32.mrf.mxu0  ;;  %v665_v5 = vpop.f32.mrf.mxu1 }
 0x188   : > { %1587 = vst [vmem:[#allocation2 + $0x8] sm:$0xff] %v1520_v2  }
 0x189   : > { %1589 = vst [vmem:[#allocation2 + $0x28] sm:$0xff] %v1530_v3  }
 0x18d   : > { %v675_v6 = vpop.f32.mrf.mxu2  ;;  %v685_v7 = vpop.f32.mrf.mxu3 }
 0x18e   : > { %v657_v8 = vpop.f32.mrf.mxu0  ;;  %v667_v9 = vpop.f32.mrf.mxu1 }
 0x18f   : > { %v1505_v10 = vpack.c.bf16 %v657_v8, %v655_v4  ;;  %v1515_v11 = vpack.c.bf16 %v667_v9, %v665_v5 }
 0x191   : > { %1584 = vst [vmem:[#allocation2] sm:$0xff] %v1505_v10  }
 0x192   : > { %1586 = vst [vmem:[#allocation2 + $0x10] sm:$0xff] %v1515_v11  }
 0x195   : > { %v677_v12 = vpop.f32.mrf.mxu2  ;;  %v687_v13 = vpop.f32.mrf.mxu3 }
 0x196   : > { %v1525_v14 = vpack.c.bf16 %v677_v12, %v675_v6  ;;  %v1535_v15 = vpack.c.bf16 %v687_v13, %v685_v7 }
 0x198   : > { %1588 = vst [vmem:[#allocation2 + $0x20] sm:$0xff] %v1525_v14  }
 0x199   : > { %1590 = vst [vmem:[#allocation2 + $0x38] sm:$0xff] %v1535_v15  }
 0x19a PF: > { %v1455_v17 = vld [vmem:[#allocation2 + $0x28] sm:$0xff]  ;;  %v1452_v20 = vld [vmem:[#allocation2 + $0x10] sm:$0xff]  ;;  %v1451_v21 = vld [vmem:[#allocation2 + $0x18] sm:$0xff] }
 0x19b   : > { %v1453_v19 = vld [vmem:[#allocation2 + $0x8] sm:$0xff]  ;;  %v1450_v22 = vld [vmem:[#allocation2] sm:$0xff]  ;;  %v1449_v23 = vld [vmem:[#allocation2 + $0x30] sm:$0xff] }
 0x19c   : > { %v1441_v24 = vld [vmem:[%s1945_s0] sm:$0xff]  ;;  %v1443_v25 = vld [vmem:[%s1945_s0 + $0x10] sm:$0xff]  ;;  %v1442_v28 = vld [vmem:[%s1945_s0 + $0x8] sm:$0xff] }
 0x19d   : > { %v1445_v26 = vld [vmem:[%s1945_s0 + $0x20] sm:$0xff]  ;;  %v1447_v27 = vld [vmem:[%s1945_s0 + $0x30] sm:$0xff]  ;;  %v1444_v29 = vld [vmem:[%s1945_s0 + $0x18] sm:$0xff] }
 0x19e   : > { %v1446_v30 = vld [vmem:[%s1945_s0 + $0x28] sm:$0xff]  ;;  %v1448_v31 = vld [vmem:[%s1945_s0 + $0x38] sm:$0xff] }
 0x19f   : > { %v1454_v18 = vld [vmem:[#allocation2 + $0x20] sm:$0xff] }
 0x1a0   : > { %v1456_v16 = vld [vmem:[#allocation2 + $0x38] sm:$0xff] }
 0x1a1   : > { %890 = vmatpush.bf16.msra.mxu0 %v1456_v16  ;;  %1646 = vmatpush.bf16.msra.mxu1 %v1456_v16 }
 0x1a2   : > { %1647 = vmatpush.bf16.msra.mxu2 %v1456_v16  ;;  %1648 = vmatpush.bf16.msra.mxu3 %v1456_v16 }
 0x1a5   : > { %891 = vmatpush.bf16.msra.mxu0 %v1455_v17  ;;  %1649 = vmatpush.bf16.msra.mxu1 %v1455_v17 }
 0x1a6   : > { %1650 = vmatpush.bf16.msra.mxu2 %v1455_v17  ;;  %1651 = vmatpush.bf16.msra.mxu3 %v1455_v17 }
 0x1a9   : > { %892 = vmatpush.bf16.msra.mxu0 %v1454_v18  ;;  %1652 = vmatpush.bf16.msra.mxu1 %v1454_v18 }
 0x1aa   : > { %1653 = vmatpush.bf16.msra.mxu2 %v1454_v18  ;;  %1654 = vmatpush.bf16.msra.mxu3 %v1454_v18 }
 0x1ad   : > { %893 = vmatpush.bf16.msra.mxu0 %v1453_v19  ;;  %1655 = vmatpush.bf16.msra.mxu1 %v1453_v19 }
 0x1ae   : > { %1656 = vmatpush.bf16.msra.mxu2 %v1453_v19  ;;  %1657 = vmatpush.bf16.msra.mxu3 %v1453_v19 }
 0x1b1   : > { %894 = vmatpush.bf16.msra.mxu0 %v1452_v20  ;;  %1658 = vmatpush.bf16.msra.mxu1 %v1452_v20 }
 0x1b2   : > { %1659 = vmatpush.bf16.msra.mxu2 %v1452_v20  ;;  %1660 = vmatpush.bf16.msra.mxu3 %v1452_v20 }
 0x1b5   : > { %895 = vmatpush.bf16.msra.mxu0 %v1451_v21  ;;  %1661 = vmatpush.bf16.msra.mxu1 %v1451_v21 }
 0x1b6   : > { %1662 = vmatpush.bf16.msra.mxu2 %v1451_v21  ;;  %1663 = vmatpush.bf16.msra.mxu3 %v1451_v21 }
 0x1b9   : > { %896 = vmatpush.bf16.msra.mxu0 %v1450_v22  ;;  %1664 = vmatpush.bf16.msra.mxu1 %v1450_v22 }
 0x1ba   : > { %1665 = vmatpush.bf16.msra.mxu2 %v1450_v22  ;;  %1666 = vmatpush.bf16.msra.mxu3 %v1450_v22 }
 0x1bd   : > { %897 = vmatpush.bf16.msra.mxu0 %v1449_v23  ;;  %1667 = vmatpush.bf16.msra.mxu1 %v1449_v23 }
 0x1be   : > { %1668 = vmatpush.bf16.msra.mxu2 %v1449_v23  ;;  %1669 = vmatpush.bf16.msra.mxu3 %v1449_v23 }
 0x1c0   : > { %898 = vmatmul.bf16.vlgmr.msra.gmra.mxu0 %v1441_v24  ;;  %908 = vmatmul.bf16.vlgmr.msra.gmra.mxu1 %v1443_v25 }
 0x1c1   : > { %918 = vmatmul.bf16.vlgmr.msra.gmra.mxu2 %v1445_v26  ;;  %928 = vmatmul.bf16.vlgmr.msra.gmra.mxu3 %v1447_v27 }
 0x1d0   : > { %903 = vmatmul.bf16.gmra.mxu0 %v1442_v28  ;;  %913 = vmatmul.bf16.gmra.mxu1 %v1444_v29 }
 0x1d1   : > { %923 = vmatmul.bf16.gmra.mxu2 %v1446_v30  ;;  %933 = vmatmul.bf16.gmra.mxu3 %v1448_v31 }
 0x23d   : > { %v899_v32 = vpop.f32.mrf.mxu0  ;;  %v909_v33 = vpop.f32.mrf.mxu1 }
 0x23e   : > { %955 = vst [vmem:[#allocation4 + $0x68] sm:$0xff] %v899_v32 }
 0x23f   : > { %959 = vst [vmem:[#allocation4 + $0x8] sm:$0xff] %v909_v33 }
 0x244   : > { %v919_v34 = vpop.f32.mrf.mxu2  ;;  %v929_v35 = vpop.f32.mrf.mxu3 }
 0x245   : > { %v901_v36 = vpop.f32.mrf.mxu0  ;;  %v911_v37 = vpop.f32.mrf.mxu1  ;;  %963 = vst [vmem:[#allocation4 + $0x10] sm:$0xff] %v919_v34 }
 0x246   : > { %967 = vst [vmem:[#allocation4 + $0x70] sm:$0xff] %v929_v35 }
 0x247   : > { %956 = vst [vmem:[#allocation4 + $0x20] sm:$0xff] %v901_v36 }
 0x248   : > { %960 = vst [vmem:[#allocation4 + $0x50] sm:$0xff] %v911_v37 }
 0x24c   : > { %v921_v38 = vpop.f32.mrf.mxu2  ;;  %v931_v39 = vpop.f32.mrf.mxu3 }
 0x24d   : > { %v904_v40 = vpop.f32.mrf.mxu0  ;;  %v914_v41 = vpop.f32.mrf.mxu1  ;;  %964 = vst [vmem:[#allocation4 + $0x48] sm:$0xff] %v921_v38 }
 0x24e   : > { %968 = vst [vmem:[#allocation4] sm:$0xff] %v931_v39 }
 0x24f   : > { %957 = vst [vmem:[#allocation4 + $0x38] sm:$0xff] %v904_v40 }
 0x250   : > { %961 = vst [vmem:[#allocation4 + $0x58] sm:$0xff] %v914_v41 }
 0x254   : > { %v924_v42 = vpop.f32.mrf.mxu2  ;;  %v934_v43 = vpop.f32.mrf.mxu3 }
 0x255   : > { %v906_v44 = vpop.f32.mrf.mxu0  ;;  %v916_v45 = vpop.f32.mrf.mxu1  ;;  %965 = vst [vmem:[#allocation4 + $0x30] sm:$0xff] %v924_v42 }
 0x256   : > { %969 = vst [vmem:[#allocation4 + $0x60] sm:$0xff] %v934_v43 }
 0x257   : > { %958 = vst [vmem:[#allocation4 + $0x78] sm:$0xff] %v906_v44 }
 0x258   : > { %962 = vst [vmem:[#allocation4 + $0x40] sm:$0xff] %v916_v45 }
 0x25a   : > { %977 = sbr.rel (%p1209_p4) target bundleno = 623 (0x26f), region = 68 }
 0x25c   : > { %v926_v46 = vpop.f32.mrf.mxu2  ;;  %v936_v47 = vpop.f32.mrf.mxu3 }
 0x25d   : > { %966 = vst [vmem:[#allocation4 + $0x28] sm:$0xff] %v926_v46 }
 0x25e   : > { %970 = vst [vmem:[#allocation4 + $0x18] sm:$0xff] %v936_v47 }
 0x25f   : > { %v978_v48 = vld [vmem:[#allocation4 + $0x68] sm:$0xff]  ;;  %v979_v49 = vld [vmem:[#allocation4 + $0x20] sm:$0xff]  ;;  %v980_v51 = vld [vmem:[#allocation4 + $0x38] sm:$0xff] }
 0x260   : > { %v1695_v50 = vld [vmem:[%s1948_s3] ss:$0 sm:$0xff]  ;;  %v981_v52 = vld [vmem:[#allocation4 + $0x78] sm:$0xff]  ;;  %v982_v53 = vld [vmem:[#allocation4 + $0x8] sm:$0xff] }
 0x261   : > { %v983_v54 = vld [vmem:[#allocation4 + $0x50] sm:$0xff]  ;;  %v984_v55 = vld [vmem:[#allocation4 + $0x58] sm:$0xff]  ;;  %v998_v56 = vadd.f32 %v1695_v50, %v978_v48  ;;  %v999_v57 = vadd.f32 %v1695_v50, %v979_v49  ;;  %v1000_v58 = vadd.f32 %v1695_v50, %v980_v51  ;;  %v1001_v59 = vadd.f32 %v1695_v50, %v981_v52  ;;  %v985_v60 = vld [vmem:[#allocation4 + $0x40] sm:$0xff] }
 0x262   : > { %v1002_v61 = vadd.f32 %v1695_v50, %v982_v53  ;;  %v1003_v62 = vadd.f32 %v1695_v50, %v983_v54  ;;  %v1004_v63 = vadd.f32 %v1695_v50, %v984_v55  ;;  %v1005_v0 = vadd.f32 %v1695_v50, %v985_v60  ;;  %v986_v1 = vld [vmem:[#allocation4 + $0x10] sm:$0xff]  ;;  %v987_v2 = vld [vmem:[#allocation4 + $0x48] sm:$0xff]  ;;  %v991_v14 = vld [vmem:[#allocation4] sm:$0xff] }
 0x263   : > { %v1014_v3 = vmax.f32 %v998_v56, 0.0  ;;  %v1015_v4 = vmax.f32 %v999_v57, 0.0  ;;  %v1016_v5 = vmax.f32 %v1000_v58, 0.0  ;;  %v1017_v6 = vmax.f32 %v1001_v59, 0.0  ;;  %v988_v7 = vld [vmem:[#allocation4 + $0x30] sm:$0xff]  ;;  %v992_v19 = vld [vmem:[#allocation4 + $0x60] sm:$0xff] }
 0x264   : > { %v989_v8 = vld [vmem:[#allocation4 + $0x28] sm:$0xff]  ;;  %v1018_v9 = vmax.f32 %v1002_v61, 0.0  ;;  %v1019_v10 = vmax.f32 %v1003_v62, 0.0  ;;  %v1020_v11 = vmax.f32 %v1004_v63, 0.0  ;;  %v1021_v12 = vmax.f32 %v1005_v0, 0.0  ;;  %v990_v13 = vld [vmem:[#allocation4 + $0x70] sm:$0xff] }
 0x265   : > { %v1540_v15 = vpack.c.bf16 %v1015_v4, %v1014_v3  ;;  %v1545_v16 = vpack.c.bf16 %v1017_v6, %v1016_v5  ;;  %v1006_v17 = vadd.f32 %v1695_v50, %v986_v1  ;;  %v1007_v18 = vadd.f32 %v1695_v50, %v987_v2  ;;  %v993_v20 = vld [vmem:[#allocation4 + $0x18] sm:$0xff] }
 0x266   : > { %v1550_v21 = vpack.c.bf16 %v1019_v10, %v1018_v9  ;;  %v1555_v22 = vpack.c.bf16 %v1021_v12, %v1020_v11  ;;  %v1008_v23 = vadd.f32 %v1695_v50, %v988_v7  ;;  %v1009_v24 = vadd.f32 %v1695_v50, %v989_v8 }
 0x267   : > { %1541 = vst [vmem:[#allocation3] sm:$0xff] %v1540_v15   ;;  %v1022_v25 = vmax.f32 %v1006_v17, 0.0  ;;  %v1023_v26 = vmax.f32 %v1007_v18, 0.0  ;;  %v1010_v27 = vadd.f32 %v1695_v50, %v990_v13  ;;  %v1011_v28 = vadd.f32 %v1695_v50, %v991_v14 }
 0x268   : > { %1591 = vst [vmem:[#allocation3 + $0x18] sm:$0xff] %v1545_v16   ;;  %v1024_v29 = vmax.f32 %v1008_v23, 0.0  ;;  %v1025_v30 = vmax.f32 %v1009_v24, 0.0  ;;  %v1012_v31 = vadd.f32 %v1695_v50, %v992_v19  ;;  %v1013_v32 = vadd.f32 %v1695_v50, %v993_v20 }
 0x269   : > { %1592 = vst [vmem:[#allocation3 + $0x10] sm:$0xff] %v1550_v21   ;;  %v1560_v33 = vpack.c.bf16 %v1023_v26, %v1022_v25  ;;  %v1026_v34 = vmax.f32 %v1010_v27, 0.0  ;;  %v1027_v35 = vmax.f32 %v1011_v28, 0.0 }
 0x26a   : > { %1593 = vst [vmem:[#allocation3 + $0x20] sm:$0xff] %v1555_v22   ;;  %v1565_v36 = vpack.c.bf16 %v1025_v30, %v1024_v29  ;;  %v1028_v37 = vmax.f32 %v1012_v31, 0.0  ;;  %v1029_v38 = vmax.f32 %v1013_v32, 0.0 }
 0x26b   : > { %1594 = vst [vmem:[#allocation3 + $0x28] sm:$0xff] %v1560_v33   ;;  %v1570_v39 = vpack.c.bf16 %v1027_v35, %v1026_v34 }
 0x26c   : > { %1595 = vst [vmem:[#allocation3 + $0x8] sm:$0xff] %v1565_v36   ;;  %v1575_v40 = vpack.c.bf16 %v1029_v38, %v1028_v37 }
 0x26d   : > { %1596 = vst [vmem:[#allocation3 + $0x30] sm:$0xff] %v1570_v39  }
 0x26e   : > { %1597 = vst [vmem:[#allocation3 + $0x38] sm:$0xff] %v1575_v40  }
 0x26f PF: > { %1070 = sbr.rel (%p1274_p5) target bundleno = 647 (0x287), region = 72 }
 0x274   : > { %v1071_v41 = vld [vmem:[#allocation4 + $0x68] sm:$0xff]  ;;  %v1696_v42 = vld [vmem:[%s1950_s5] ss:$0 sm:$0xff]  ;;  %v1073_v44 = vld [vmem:[#allocation4 + $0x38] sm:$0xff] }
 0x275   : > { %v1072_v43 = vld [vmem:[#allocation4 + $0x20] sm:$0xff]  ;;  %v1074_v45 = vld [vmem:[#allocation4 + $0x78] sm:$0xff]  ;;  %v1091_v46 = vadd.f32 %v1696_v42, %v1071_v41  ;;  %v1093_v48 = vadd.f32 %v1696_v42, %v1073_v44  ;;  %v1075_v49 = vld [vmem:[#allocation4 + $0x8] sm:$0xff] }
 0x276   : > { %v1092_v47 = vadd.f32 %v1696_v42, %v1072_v43  ;;  %v1076_v50 = vld [vmem:[#allocation4 + $0x50] sm:$0xff]  ;;  %v1094_v51 = vadd.f32 %v1696_v42, %v1074_v45  ;;  %v1077_v52 = vld [vmem:[#allocation4 + $0x58] sm:$0xff]  ;;  %v1095_v53 = vadd.f32 %v1696_v42, %v1075_v49  ;;  %v1078_v54 = vld [vmem:[#allocation4 + $0x40] sm:$0xff] }
 0x277   : > { %1107 = vst [vmem:[%s1951_s6] sm:$0xff] %v1091_v46  ;;  %v1096_v55 = vadd.f32 %v1696_v42, %v1076_v50  ;;  %v1079_v56 = vld [vmem:[#allocation4 + $0x10] sm:$0xff]  ;;  %v1097_v57 = vadd.f32 %v1696_v42, %v1077_v52  ;;  %v1080_v58 = vld [vmem:[#allocation4 + $0x48] sm:$0xff]  ;;  %v1098_v59 = vadd.f32 %v1696_v42, %v1078_v54  ;;  %v1084_v2 = vld [vmem:[#allocation4] sm:$0xff] }
 0x278   : > { %1108 = vst [vmem:[%s1951_s6 + $0x8] sm:$0xff] %v1092_v47  ;;  %v1081_v60 = vld [vmem:[#allocation4 + $0x30] sm:$0xff]  ;;  %v1099_v61 = vadd.f32 %v1696_v42, %v1079_v56  ;;  %v1082_v62 = vld [vmem:[#allocation4 + $0x28] sm:$0xff]  ;;  %v1100_v63 = vadd.f32 %v1696_v42, %v1080_v58  ;;  %v1085_v4 = vld [vmem:[#allocation4 + $0x60] sm:$0xff]  ;;  %v1104_v7 = vadd.f32 %v1696_v42, %v1084_v2 }
 0x279   : > { %1109 = vst [vmem:[%s1951_s6 + $0x10] sm:$0xff] %v1093_v48  ;;  %v1083_v0 = vld [vmem:[#allocation4 + $0x70] sm:$0xff]  ;;  %v1101_v1 = vadd.f32 %v1696_v42, %v1081_v60  ;;  %v1102_v3 = vadd.f32 %v1696_v42, %v1082_v62  ;;  %v1086_v6 = vld [vmem:[#allocation4 + $0x18] sm:$0xff]  ;;  %v1105_v8 = vadd.f32 %v1696_v42, %v1085_v4 }
 0x27a   : > { %1110 = vst [vmem:[%s1951_s6 + $0x18] sm:$0xff] %v1094_v51  ;;  %v1103_v5 = vadd.f32 %v1696_v42, %v1083_v0  ;;  %v1106_v9 = vadd.f32 %v1696_v42, %v1086_v6 }
 0x27b   : > { %1111 = vst [vmem:[%s1951_s6 + $0x20] sm:$0xff] %v1095_v53 }
 0x27c   : > { %1112 = vst [vmem:[%s1951_s6 + $0x28] sm:$0xff] %v1096_v55 }
 0x27d   : > { %1113 = vst [vmem:[%s1951_s6 + $0x30] sm:$0xff] %v1097_v57 }
 0x27e   : > { %1114 = vst [vmem:[%s1951_s6 + $0x38] sm:$0xff] %v1098_v59 }
 0x27f   : > { %1115 = vst [vmem:[%s1951_s6 + $0x40] sm:$0xff] %v1099_v61 }
 0x280   : > { %1116 = vst [vmem:[%s1951_s6 + $0x48] sm:$0xff] %v1100_v63 }
 0x281   : > { %1117 = vst [vmem:[%s1951_s6 + $0x50] sm:$0xff] %v1101_v1 }
 0x282   : > { %1118 = vst [vmem:[%s1951_s6 + $0x58] sm:$0xff] %v1102_v3 }
 0x283   : > { %1119 = vst [vmem:[%s1951_s6 + $0x60] sm:$0xff] %v1103_v5 }
 0x284   : > { %1120 = vst [vmem:[%s1951_s6 + $0x68] sm:$0xff] %v1104_v7 }
 0x285   : > { %1121 = vst [vmem:[%s1951_s6 + $0x70] sm:$0xff] %v1105_v8 }
 0x286   : > { %1122 = vst [vmem:[%s1951_s6 + $0x78] sm:$0xff] %v1106_v9 }
 0x287 PF: > { %s16_s23 = sadd.s32 1, %s1719_s23   ;;  %s1952_s21 = smov %s1715_s22 }
 0x288   : > { %p13_p6 = scmp.ge.s32.totalorder %s16_s23, 4   ;;  %s1953_s22 = smov %s1955_s24 }
 0x28a   :  { %15 = sbr.rel (!%p13_p6) target bundleno = 2 (0x2), region = 104 }

</bundles_post_ra>
